<compile_context>
chip_gen: v6e
topology: v6e:2x2x1
jax: 0.10.0
libtpu: 0.0.40
codegen_flags: <defaults>
</compile_context>

<pallas_src>
import functools

import jax
import jax.numpy as jnp
from jax.experimental import pallas as pl
from jax.experimental.pallas import tpu as pltpu


def _gated_tconv_kernel(x_ref, w_ref, b_ref, o_ref, xpad_ref,
                        *, K, dil, B, T, N, F, Cout):
    # x_ref   : (B*T*N, F)          all batches flat; within a batch rows are
    #                               time-major with nodes innermost.
    # w_ref   : (K, F, 2*Cout)      fused conv weight, tap-major, both halves.
    # b_ref   : (1, 2*Cout)         fused bias.
    # o_ref   : (B*T*N, Cout)       gated output.
    # xpad_ref: (pad_rows + B*T*N, F) VMEM scratch: causal zero-pad + activations.
    TN = T * N
    M = B * TN
    pad_rows = (K - 1) * dil * N
    step = dil * N  # tap row stride; == 8 here, so tap slices stay sublane-aligned

    # Fill the scratch once: zero the causal-pad rows, copy all activations below.
    xpad_ref[0:pad_rows, :] = jnp.zeros((pad_rows, F), dtype=xpad_ref.dtype)
    xpad_ref[pad_rows:pad_rows + M, :] = x_ref[...]

    # Row position within its own batch: used to mask cross-batch tap leakage
    # (rows of batch i>0 whose causal tap falls in the pad would otherwise read
    # batch i-1's tail in this flat layout; batch 0 reads the true zero pad).
    row_in_batch = jax.lax.broadcasted_iota(jnp.int32, (M, 1), 0) % TN

    # Bias folded into the accumulator init; K accumulating (M,F)@(F,2*Cout)
    # MXU dots with f32 accumulation, native-dtype operands.
    acc = jnp.broadcast_to(b_ref[...].astype(jnp.float32), (M, 2 * Cout))
    for k in range(K):  # K is tiny (3): static unroll
        tap = xpad_ref[k * step:k * step + M, :]
        valid = row_in_batch >= (K - 1 - k) * step
        tap = jnp.where(valid, tap, jnp.zeros_like(tap))
        acc = acc + jnp.dot(tap, w_ref[k], preferred_element_type=jnp.float32)

    out_half, gate_half = acc[:, :Cout], acc[:, Cout:]
    # sigmoid(z) == 0.5*tanh(0.5*z) + 0.5  -> exactly two tanh EUP ops/element.
    gate = 0.5 * jnp.tanh(0.5 * gate_half) + 0.5
    o_ref[...] = (jnp.tanh(out_half) * gate).astype(o_ref.dtype)


def gated_temp_conv(x, weight, bias, *, kernel_size, dilation=1):
    """x: (b, t, n, f); weight: (2*Cout, f, K) [torch Conv1d layout]; bias: (2*Cout,)."""
    b, t, n, f = x.shape
    cout2, f_w, K = weight.shape
    assert f_w == f and K == kernel_size
    cout = cout2 // 2
    pad_rows = (K - 1) * dilation * n
    M = b * t * n

    # Free contiguous (metadata-only) reshape: (b, t, n, f) -> (b*t*n, f).
    xr = x.reshape(M, f)

    # Tiny parameter-side prep: Conv1d weight (2*Cout, F, K) -> tap-major
    # (K, F, 2*Cout); both gate halves stay fused in one operand.
    w_fused = jnp.transpose(weight, (2, 1, 0))
    b_fused = bias.reshape(1, cout2)

    kernel = functools.partial(_gated_tconv_kernel, K=K, dil=dilation,
                               B=b, T=t, N=n, F=f, Cout=cout)

    out = pl.pallas_call(
        kernel,
        out_shape=jax.ShapeDtypeStruct((M, cout), x.dtype),
        grid=(1,),
        in_specs=[
            pl.BlockSpec((M, f), lambda i: (0, 0)),
            pl.BlockSpec((K, f, cout2), lambda i: (0, 0, 0)),
            pl.BlockSpec((1, cout2), lambda i: (0, 0)),
        ],
        out_specs=pl.BlockSpec((M, cout), lambda i: (0, 0)),
        scratch_shapes=[pltpu.VMEM((pad_rows + M, f), x.dtype)],
        compiler_params=pltpu.CompilerParams(
            dimension_semantics=("arbitrary",)),
    )(xr, w_fused, b_fused)

    # Free contiguous reshape back: (b*t*n, Cout) -> (b, t, n, Cout).
    return out.reshape(b, t, n, cout)


def _reference(x, weight, bias, *, kernel_size, dilation=1):
    """Pure-JAX reference reproducing the PyTorch forward exactly."""
    b, t, n, f = x.shape
    cout2 = weight.shape[0]
    cout = cout2 // 2
    pad = (kernel_size - 1) * dilation
    xr = jnp.transpose(x, (0, 2, 3, 1)).reshape(b * n, f, t)       # (BN, F, T)
    xp = jnp.pad(xr, ((0, 0), (0, 0), (pad, 0)))
    y = jax.lax.conv_general_dilated(
        xp, weight, window_strides=(1,), padding="VALID",
        rhs_dilation=(dilation,), dimension_numbers=("NCH", "OIH", "NCH"))
    y = y + bias[None, :, None]
    y = jnp.transpose(y.reshape(b, n, cout2, t), (0, 3, 1, 2))     # (b, t, n, 2*Cout)
    out_half, gate_half = y[..., :cout], y[..., cout:]
    return jnp.tanh(out_half) * jax.nn.sigmoid(gate_half)


if __name__ == "__main__":
    # Module config (deterministic synthetic params).
    input_channels = 8       # f
    output_channels = 8      # Cout
    kernel_size = 3
    dilation = 2

    # Small input: (batch=2, time=16, nodes=4, feat=8)
    b, t, n, f = 2, 16, 4, input_channels

    key = jax.random.PRNGKey(0)
    kx, kw, kb = jax.random.split(key, 3)
    x = jax.random.normal(kx, (b, t, n, f), dtype=jnp.float32)
    weight = 0.1 * jax.random.normal(
        kw, (2 * output_channels, input_channels, kernel_size), dtype=jnp.float32)
    bias = 0.1 * jax.random.normal(kb, (2 * output_channels,), dtype=jnp.float32)

    y = gated_temp_conv(x, weight, bias, kernel_size=kernel_size, dilation=dilation)
    y = jax.block_until_ready(y)

    y_ref = _reference(x, weight, bias, kernel_size=kernel_size, dilation=dilation)
    assert y.shape == (b, t, n, output_channels), y.shape
    assert jnp.allclose(y, y_ref, atol=1e-5, rtol=1e-5), "mismatch vs reference"

    print("KERNEL_OK")
</pallas_src>

<mosaic_0001>
module attributes {stable_mosaic.version = 11 : i64} {
  func.func @_gated_tconv_kernel(%arg0: i32, %arg1: memref<128x8xf32, #tpu.memory_space<vmem>>, %arg2: memref<3x8x16xf32, #tpu.memory_space<vmem>>, %arg3: memref<1x16xf32, #tpu.memory_space<vmem>>, %arg4: memref<128x8xf32, #tpu.memory_space<vmem>>, %arg5: memref<144x8xf32, #tpu.memory_space<vmem>>) attributes {dimension_semantics = [#tpu.dimension_semantics<arbitrary>], iteration_bounds = array<i64: 1>, scalar_prefetch = 0 : i64, scratch_operands = 1 : i64, tpu.core_type = #tpu.core_type<tc>, window_params = [{pipeline_mode = #tpu.pipeline_mode<synchronous>, transform_indices = @transform_0, window_bounds = array<i64: 128, 8>}, {pipeline_mode = #tpu.pipeline_mode<synchronous>, transform_indices = @transform_1, window_bounds = array<i64: 3, 8, 16>}, {pipeline_mode = #tpu.pipeline_mode<synchronous>, transform_indices = @transform_2, window_bounds = array<i64: 1, 16>}, {pipeline_mode = #tpu.pipeline_mode<synchronous>, transform_indices = @transform_3, window_bounds = array<i64: 128, 8>}]} {
    %cst = arith.constant 0.000000e+00 : f32
    %0 = vector.broadcast %cst : f32 to vector<16x8xf32>
    %c0 = arith.constant 0 : index
    %c0_0 = arith.constant 0 : index
    %1 = vector.load %arg5[%c0, %c0_0] : memref<144x8xf32, #tpu.memory_space<vmem>>, vector<16x8xf32>
    tpu.vector_store %arg5[%c0, %c0_0], %0 {strides = array<i32>} : memref<144x8xf32, #tpu.memory_space<vmem>>, vector<16x8xf32>,
    %c0_1 = arith.constant 0 : index
    %c0_2 = arith.constant 0 : index
    %2 = vector.load %arg1[%c0_1, %c0_2] : memref<128x8xf32, #tpu.memory_space<vmem>>, vector<128x8xf32>
    %c16 = arith.constant 16 : index
    %c0_3 = arith.constant 0 : index
    %3 = vector.load %arg5[%c16, %c0_3] : memref<144x8xf32, #tpu.memory_space<vmem>>, vector<128x8xf32>
    tpu.vector_store %arg5[%c16, %c0_3], %2 {strides = array<i32>} : memref<144x8xf32, #tpu.memory_space<vmem>>, vector<128x8xf32>,
    %4 = tpu.iota {dimensions = array<i32: 0>} : vector<128x1xi32>
    %c64_i32 = arith.constant 64 : i32
    %c0_i32 = arith.constant 0 : i32
    %5 = arith.cmpi eq, %c64_i32, %c0_i32 : i32
    %c1_i32 = arith.constant 1 : i32
    %6 = arith.select %5, %c1_i32, %c64_i32 : i32
    %7 = vector.broadcast %6 : i32 to vector<128x1xi32>
    %8 = arith.remsi %4, %7 : vector<128x1xi32>
    %c0_i32_4 = arith.constant 0 : i32
    %9 = vector.broadcast %c0_i32_4 : i32 to vector<128x1xi32>
    %10 = arith.cmpi ne, %8, %9 : vector<128x1xi32>
    %c0_i32_5 = arith.constant 0 : i32
    %11 = vector.broadcast %c0_i32_5 : i32 to vector<128x1xi32>
    %12 = arith.cmpi slt, %8, %11 : vector<128x1xi32>
    %c0_i32_6 = arith.constant 0 : i32
    %13 = arith.cmpi slt, %6, %c0_i32_6 : i32
    %14 = vector.broadcast %13 : i1 to vector<128x1xi1>
    %15 = vector.broadcast %14 : vector<128x1xi1> to vector<128x1xi1>
    %16 = arith.xori %12, %15 : vector<128x1xi1>
    %17 = arith.andi %16, %10 : vector<128x1xi1>
    %18 = vector.broadcast %6 : i32 to vector<128x1xi32>
    %19 = arith.addi %8, %18 : vector<128x1xi32>
    %20 = arith.select %17, %19, %8 : vector<128x1xi1>, vector<128x1xi32>
    %c0_7 = arith.constant 0 : index
    %c0_8 = arith.constant 0 : index
    %21 = vector.load %arg3[%c0_7, %c0_8] : memref<1x16xf32, #tpu.memory_space<vmem>>, vector<1x16xf32>
    %22 = vector.shape_cast %21 : vector<1x16xf32> to vector<1x16xf32>
    %23 = vector.broadcast %22 : vector<1x16xf32> to vector<128x16xf32>
    %c0_9 = arith.constant 0 : index
    %c0_10 = arith.constant 0 : index
    %24 = vector.load %arg5[%c0_9, %c0_10] : memref<144x8xf32, #tpu.memory_space<vmem>>, vector<128x8xf32>
    %c16_i32 = arith.constant 16 : i32
    %25 = vector.broadcast %c16_i32 : i32 to vector<128x1xi32>
    %26 = arith.cmpi sge, %20, %25 : vector<128x1xi32>
    %cst_11 = arith.constant 0.000000e+00 : f32
    %27 = vector.broadcast %cst_11 : f32 to vector<128x8xf32>
    %28 = vector.shape_cast %26 : vector<128x1xi1> to vector<128x1xi1>
    %29 = vector.broadcast %28 : vector<128x1xi1> to vector<128x8xi1>
    %30 = arith.select %29, %24, %27 : vector<128x8xi1>, vector<128x8xf32>
    %c0_12 = arith.constant 0 : index
    %c0_13 = arith.constant 0 : index
    %c0_14 = arith.constant 0 : index
    %31 = vector.load %arg2[%c0_12, %c0_13, %c0_14] : memref<3x8x16xf32, #tpu.memory_space<vmem>>, vector<1x8x16xf32>
    %32 = vector.shape_cast %31 : vector<1x8x16xf32> to vector<8x16xf32>
    %cst_15 = arith.constant dense<0.000000e+00> : vector<128x16xf32>
    %33 = tpu.matmul %30, %32, %cst_15 {dimension_numbers = #tpu.dot_dimension_numbers<[1], [0], [0], [1], [0, 0, 1, 1], [], []>} : vector<128x8xf32>, vector<8x16xf32>, vector<128x16xf32> -> vector<128x16xf32>
    %34 = arith.addf %23, %33 : vector<128x16xf32>
    %c8 = arith.constant 8 : index
    %c0_16 = arith.constant 0 : index
    %35 = vector.load %arg5[%c8, %c0_16] : memref<144x8xf32, #tpu.memory_space<vmem>>, vector<128x8xf32>
    %c8_i32 = arith.constant 8 : i32
    %36 = vector.broadcast %c8_i32 : i32 to vector<128x1xi32>
    %37 = arith.cmpi sge, %20, %36 : vector<128x1xi32>
    %cst_17 = arith.constant 0.000000e+00 : f32
    %38 = vector.broadcast %cst_17 : f32 to vector<128x8xf32>
    %39 = vector.shape_cast %37 : vector<128x1xi1> to vector<128x1xi1>
    %40 = vector.broadcast %39 : vector<128x1xi1> to vector<128x8xi1>
    %41 = arith.select %40, %35, %38 : vector<128x8xi1>, vector<128x8xf32>
    %c1 = arith.constant 1 : index
    %c0_18 = arith.constant 0 : index
    %c0_19 = arith.constant 0 : index
    %42 = vector.load %arg2[%c1, %c0_18, %c0_19] : memref<3x8x16xf32, #tpu.memory_space<vmem>>, vector<1x8x16xf32>
    %43 = vector.shape_cast %42 : vector<1x8x16xf32> to vector<8x16xf32>
    %cst_20 = arith.constant dense<0.000000e+00> : vector<128x16xf32>
    %44 = tpu.matmul %41, %43, %cst_20 {dimension_numbers = #tpu.dot_dimension_numbers<[1], [0], [0], [1], [0, 0, 1, 1], [], []>} : vector<128x8xf32>, vector<8x16xf32>, vector<128x16xf32> -> vector<128x16xf32>
    %45 = arith.addf %34, %44 : vector<128x16xf32>
    %c16_21 = arith.constant 16 : index
    %c0_22 = arith.constant 0 : index
    %46 = vector.load %arg5[%c16_21, %c0_22] : memref<144x8xf32, #tpu.memory_space<vmem>>, vector<128x8xf32>
    %c0_i32_23 = arith.constant 0 : i32
    %47 = vector.broadcast %c0_i32_23 : i32 to vector<128x1xi32>
    %48 = arith.cmpi sge, %20, %47 : vector<128x1xi32>
    %cst_24 = arith.constant 0.000000e+00 : f32
    %49 = vector.broadcast %cst_24 : f32 to vector<128x8xf32>
    %50 = vector.shape_cast %48 : vector<128x1xi1> to vector<128x1xi1>
    %51 = vector.broadcast %50 : vector<128x1xi1> to vector<128x8xi1>
    %52 = arith.select %51, %46, %49 : vector<128x8xi1>, vector<128x8xf32>
    %c2 = arith.constant 2 : index
    %c0_25 = arith.constant 0 : index
    %c0_26 = arith.constant 0 : index
    %53 = vector.load %arg2[%c2, %c0_25, %c0_26] : memref<3x8x16xf32, #tpu.memory_space<vmem>>, vector<1x8x16xf32>
    %54 = vector.shape_cast %53 : vector<1x8x16xf32> to vector<8x16xf32>
    %cst_27 = arith.constant dense<0.000000e+00> : vector<128x16xf32>
    %55 = tpu.matmul %52, %54, %cst_27 {dimension_numbers = #tpu.dot_dimension_numbers<[1], [0], [0], [1], [0, 0, 1, 1], [], []>} : vector<128x8xf32>, vector<8x16xf32>, vector<128x16xf32> -> vector<128x16xf32>
    %56 = arith.addf %45, %55 : vector<128x16xf32>
    %57 = vector.extract_strided_slice %56 {offsets = [0, 0], sizes = [128, 8], strides = [1, 1]} : vector<128x16xf32> to vector<128x8xf32>
    %58 = vector.extract_strided_slice %56 {offsets = [0, 8], sizes = [128, 8], strides = [1, 1]} : vector<128x16xf32> to vector<128x8xf32>
    %cst_28 = arith.constant 5.000000e-01 : f32
    %59 = vector.broadcast %cst_28 : f32 to vector<128x8xf32>
    %60 = arith.mulf %59, %58 : vector<128x8xf32>
    %61 = math.tanh %60 : vector<128x8xf32>
    %cst_29 = arith.constant 5.000000e-01 : f32
    %62 = vector.broadcast %cst_29 : f32 to vector<128x8xf32>
    %63 = arith.mulf %62, %61 : vector<128x8xf32>
    %cst_30 = arith.constant 5.000000e-01 : f32
    %64 = vector.broadcast %cst_30 : f32 to vector<128x8xf32>
    %65 = arith.addf %63, %64 : vector<128x8xf32>
    %66 = math.tanh %57 : vector<128x8xf32>
    %67 = arith.mulf %66, %65 : vector<128x8xf32>
    %c0_31 = arith.constant 0 : index
    %c0_32 = arith.constant 0 : index
    %68 = vector.load %arg4[%c0_31, %c0_32] : memref<128x8xf32, #tpu.memory_space<vmem>>, vector<128x8xf32>
    tpu.vector_store %arg4[%c0_31, %c0_32], %67 {strides = array<i32>} : memref<128x8xf32, #tpu.memory_space<vmem>>, vector<128x8xf32>,
    return
  }
  func.func @transform_0(%arg0: i32) -> (i32, i32) {
    %c0_i32 = arith.constant 0 : i32
    %c0_i32_0 = arith.constant 0 : i32
    %c0_i32_1 = arith.constant 0 : i32
    return %c0_i32, %c0_i32_0 : i32, i32
  }
  func.func @transform_1(%arg0: i32) -> (i32, i32, i32) {
    %c0_i32 = arith.constant 0 : i32
    %c0_i32_0 = arith.constant 0 : i32
    %c0_i32_1 = arith.constant 0 : i32
    %c0_i32_2 = arith.constant 0 : i32
    return %c0_i32, %c0_i32_0, %c0_i32_1 : i32, i32, i32
  }
  func.func @transform_2(%arg0: i32) -> (i32, i32) {
    %c0_i32 = arith.constant 0 : i32
    %c0_i32_0 = arith.constant 0 : i32
    %c0_i32_1 = arith.constant 0 : i32
    return %c0_i32, %c0_i32_0 : i32, i32
  }
  func.func @transform_3(%arg0: i32) -> (i32, i32) {
    %c0_i32 = arith.constant 0 : i32
    %c0_i32_0 = arith.constant 0 : i32
    %c0_i32_1 = arith.constant 0 : i32
    return %c0_i32, %c0_i32_0 : i32, i32
  }
}

</mosaic_0001>

<bundles_post_ra>
// kernel: tpu_custom_call.1
= control target key start
LH: loop header
LB: loop body
LE: loop exit
PB: predicated region body
PF: predicated region fallthrough
CT: control target
= control target key end

     0   :  { %vm14_vm0 = vcmask 64512   ;;  %v1559_v1 = vmov 0.0   ;;  %s1891_s1 = inlined_call_operand.vmem [shape: f32[3,8,16], index: 1, kind: input, shape index: {}]   ;;  %s1892_s0 = inlined_call_operand.vmem [shape: f32[128,8], index: 0, kind: input, shape index: {}]   ;;  %s1893_s2 = inlined_call_operand.vmem [shape: f32[1,16], index: 2, kind: input, shape index: {}]   ;;  %s1894_s3 = inlined_call_operand.vmem [shape: f32[128,8], index: 3, kind: output, shape index: {}]  }
   0x1   :  { %v345_v0 = vld [vmem:[%s1891_s1] sm:$0xff]  ;;  %1427 = vmatprep.mubr.f32.mxu1 %v1559_v1  ;;  %1415 = vmatprep.mubr.f32.mxu0 %v1559_v1  ;;  %v1330_v2 = vld [vmem:[%s1891_s1 + $0x8] sm:$0xff]  ;;  %v1345_v3 = vld [vmem:[%s1891_s1 + $0x10] sm:$0xff] }
   0x2   :  { %1491 = vmatprep.subr.mxu1 %v345_v0  ;;  %1413 = vmatprep.subr.mxu0 %v345_v0  ;;  %v17_v4 = vld [vmem:[%s1892_s0] sm:$0xff]  ;;  %v18_v6 = vld [vmem:[%s1892_s0 + $0x8] sm:$0xff]  ;;  %v19_v8 = vld [vmem:[%s1892_s0 + $0x10] sm:$0xff] }
   0x3   :  { %v25_v5 = vld [vmem:[%s1892_s0 + $0x40] sm:$0xff]  ;;  %1492 = vmatpush3.msra.mxu1 %v345_v0  ;;  %1414 = vmatpush3.msra.mxu0 %v345_v0  ;;  %33 = vst.msk [vmem:[#allocation2 + $0x10] sm:$0xff] %vm14_vm0, %v17_v4  ;;  %34 = vst.msk [vmem:[#allocation2 + $0x18] sm:$0xff] %vm14_vm0, %v18_v6  ;;  %v26_v7 = vld [vmem:[%s1892_s0 + $0x48] sm:$0xff] }
   0x4   :  { %41 = vst.msk [vmem:[#allocation2 + $0x50] sm:$0xff] %vm14_vm0, %v25_v5  ;;  %v27_v9 = vld [vmem:[%s1892_s0 + $0x50] sm:$0xff]  ;;  %1428 = vmatmul.mubr.f32.vlgmr.msra.gmra.mxu1 %v1559_v1  ;;  %1439 = vmatprep.subr.mxu1 %v1330_v2  ;;  %42 = vst.msk [vmem:[#allocation2 + $0x58] sm:$0xff] %vm14_vm0, %v26_v7  ;;  %v20_v10 = vld [vmem:[%s1892_s0 + $0x18] sm:$0xff] }
   0x5   :  { %35 = vst.msk [vmem:[#allocation2 + $0x20] sm:$0xff] %vm14_vm0, %v19_v8  ;;  %43 = vst.msk [vmem:[#allocation2 + $0x60] sm:$0xff] %vm14_vm0, %v27_v9  ;;  %v28_v11 = vld [vmem:[%s1892_s0 + $0x58] sm:$0xff]  ;;  %v21_v12 = vld [vmem:[%s1892_s0 + $0x20] sm:$0xff]  ;;  %1416 = vmatmul.mubr.f32.vlgmr.msra.gmra.mxu0 %v1559_v1  ;;  %1440 = vmatpush3.msra.mxu1 %v1330_v2 }
   0x6   :  { %36 = vst.msk [vmem:[#allocation2 + $0x28] sm:$0xff] %vm14_vm0, %v20_v10  ;;  %44 = vst.msk [vmem:[#allocation2 + $0x68] sm:$0xff] %vm14_vm0, %v28_v11  ;;  %v29_v13 = vld [vmem:[%s1892_s0 + $0x60] sm:$0xff]  ;;  %v22_v14 = vld [vmem:[%s1892_s0 + $0x28] sm:$0xff]  ;;  %1465 = vmatprep.subr.mxu0 %v1345_v3 }
   0x7   :  { %37 = vst.msk [vmem:[#allocation2 + $0x30] sm:$0xff] %vm14_vm0, %v21_v12  ;;  %v30_v15 = vld [vmem:[%s1892_s0 + $0x68] sm:$0xff]  ;;  %45 = vst.msk [vmem:[#allocation2 + $0x70] sm:$0xff] %vm14_vm0, %v29_v13  ;;  %v23_v16 = vld [vmem:[%s1892_s0 + $0x30] sm:$0xff]  ;;  %1466 = vmatpush3.msra.mxu0 %v1345_v3 }
   0x8   :  { %38 = vst.msk [vmem:[#allocation2 + $0x38] sm:$0xff] %vm14_vm0, %v22_v14  ;;  %46 = vst.msk [vmem:[#allocation2 + $0x78] sm:$0xff] %vm14_vm0, %v30_v15  ;;  %v24_v17 = vld [vmem:[%s1892_s0 + $0x38] sm:$0xff]  ;;  %v31_v18 = vld [vmem:[%s1892_s0 + $0x70] sm:$0xff] }
   0x9   :  { %39 = vst.msk [vmem:[#allocation2 + $0x40] sm:$0xff] %vm14_vm0, %v23_v16  ;;  %40 = vst.msk [vmem:[#allocation2 + $0x48] sm:$0xff] %vm14_vm0, %v24_v17  ;;  %v32_v19 = vld [vmem:[%s1892_s0 + $0x78] sm:$0xff]  ;;  %v1719_v50 = vld [vmem:[%s1893_s2] ss:$0 sm:$0xff]  ;;  %s1560_s2 = smov 120  }
   0xa   :  { %47 = vst.msk [vmem:[#allocation2 + $0x80] sm:$0xff] %vm14_vm0, %v31_v18  ;;  %48 = vst.msk [vmem:[#allocation2 + $0x88] sm:$0xff] %vm14_vm0, %v32_v19  ;;  %v267_v20 = vld [vmem:[#allocation2 + $0x10] sm:$0xff]  ;;  %v268_v22 = vld [vmem:[#allocation2 + $0x18] sm:$0xff] }
   0xb   :  { %v275_v21 = vld [vmem:[#allocation2 + $0x50] sm:$0xff]  ;;  %1418 = vmatprep.mubr.msk.f32.mxu0 %vm14_vm0, %v267_v20  ;;  %v276_v23 = vld [vmem:[#allocation2 + $0x58] sm:$0xff] }
   0xc   :  { %1430 = vmatprep.mubr.msk.f32.mxu1 %vm14_vm0, %v275_v21  ;;  %v269_v24 = vld [vmem:[#allocation2 + $0x20] sm:$0xff]  ;;  %1419 = vmatmul.mubr.msk.f32.gmra.mxu0 %vm14_vm0, %v268_v22 }
   0xd   :  { %v277_v25 = vld [vmem:[#allocation2 + $0x60] sm:$0xff]  ;;  %1431 = vmatmul.mubr.msk.f32.gmra.mxu1 %vm14_vm0, %v276_v23  ;;  %1421 = vmatprep.mubr.msk.f32.mxu0 %vm14_vm0, %v269_v24  ;;  %v270_v26 = vld [vmem:[#allocation2 + $0x28] sm:$0xff] }
   0xe   :  { %1433 = vmatprep.mubr.msk.f32.mxu1 %vm14_vm0, %v277_v25  ;;  %v278_v27 = vld [vmem:[#allocation2 + $0x68] sm:$0xff]  ;;  %v271_v28 = vld [vmem:[#allocation2 + $0x30] sm:$0xff] }
   0xf   :  { %v279_v29 = vld [vmem:[#allocation2 + $0x70] sm:$0xff]  ;;  %v272_v30 = vld [vmem:[#allocation2 + $0x38] sm:$0xff] }
  0x10   :  { %1422 = vmatmul.mubr.msk.f32.gmra.mxu0 %vm14_vm0, %v270_v26  ;;  %v280_v31 = vld [vmem:[#allocation2 + $0x78] sm:$0xff]  ;;  %v562_v32 = vld [vmem:[#allocation2 + $0x40] sm:$0xff]  ;;  %v853_v33 = vld [vmem:[#allocation2 + $0x48] sm:$0xff] }
  0x11   :  { %1434 = vmatmul.mubr.msk.f32.gmra.mxu1 %vm14_vm0, %v278_v27  ;;  %1424 = vmatprep.mubr.msk.f32.mxu0 %vm14_vm0, %v271_v28  ;;  %v570_v34 = vld [vmem:[#allocation2 + $0x80] sm:$0xff]  ;;  %v861_v35 = vld [vmem:[#allocation2 + $0x88] sm:$0xff] }
  0x12   :  { %1436 = vmatprep.mubr.msk.f32.mxu1 %vm14_vm0, %v279_v29 }
  0x14   :  { %1425 = vmatmul.mubr.msk.f32.gmra.mxu0 %vm14_vm0, %v272_v30 }
  0x15   :  { %1437 = vmatmul.mubr.msk.f32.gmra.mxu1 %vm14_vm0, %v280_v31  ;;  %1467 = vmatprep.mubr.msk.f32.mxu0 %vm14_vm0, %v267_v20 }
  0x16   :  { %1441 = vmatprep.mubr.f32.mxu1 %v1559_v1 }
  0x18   :  { %1468 = vmatmul.mubr.msk.f32.vlgmr.msra.gmra.mxu0 %vm14_vm0, %v268_v22 }
  0x19   :  { %1442 = vmatmul.mubr.msk.f32.vlgmr.msra.gmra.mxu1 %vm14_vm0, %v267_v20  ;;  %1470 = vmatprep.mubr.msk.f32.mxu0 %vm14_vm0, %v269_v24 }
  0x1a   :  { %1444 = vmatprep.mubr.msk.f32.mxu1 %vm14_vm0, %v268_v22 }
  0x1c   :  { %1471 = vmatmul.mubr.msk.f32.gmra.mxu0 %vm14_vm0, %v270_v26 }
  0x1d   :  { %1445 = vmatmul.mubr.msk.f32.gmra.mxu1 %vm14_vm0, %v269_v24  ;;  %1473 = vmatprep.mubr.msk.f32.mxu0 %vm14_vm0, %v271_v28 }
  0x1e   :  { %1447 = vmatprep.mubr.msk.f32.mxu1 %vm14_vm0, %v270_v26 }
  0x20   :  { %1474 = vmatmul.mubr.msk.f32.gmra.mxu0 %vm14_vm0, %v272_v30 }
  0x21   :  { %1448 = vmatmul.mubr.msk.f32.gmra.mxu1 %vm14_vm0, %v271_v28  ;;  %1476 = vmatprep.mubr.msk.f32.mxu0 %vm14_vm0, %v562_v32 }
  0x22   :  { %1450 = vmatprep.mubr.msk.f32.mxu1 %vm14_vm0, %v272_v30 }
  0x24   :  { %1477 = vmatmul.mubr.msk.f32.gmra.mxu0 %vm14_vm0, %v853_v33 }
  0x25   :  { %1451 = vmatmul.mubr.msk.f32.gmra.mxu1 %vm14_vm0, %v562_v32  ;;  %1479 = vmatprep.mubr.msk.f32.mxu0 %vm14_vm0, %v275_v21 }
  0x26   :  { %1453 = vmatprep.mubr.f32.mxu1 %v1559_v1 }
  0x28   :  { %1480 = vmatmul.mubr.msk.f32.gmra.mxu0 %vm14_vm0, %v276_v23 }
  0x29   :  { %1454 = vmatmul.mubr.msk.f32.gmra.mxu1 %vm14_vm0, %v275_v21  ;;  %1482 = vmatprep.mubr.msk.f32.mxu0 %vm14_vm0, %v277_v25 }
  0x2a   :  { %1456 = vmatprep.mubr.msk.f32.mxu1 %vm14_vm0, %v276_v23 }
  0x2c   :  { %1483 = vmatmul.mubr.msk.f32.gmra.mxu0 %vm14_vm0, %v278_v27 }
  0x2d   :  { %1457 = vmatmul.mubr.msk.f32.gmra.mxu1 %vm14_vm0, %v277_v25  ;;  %1485 = vmatprep.mubr.msk.f32.mxu0 %vm14_vm0, %v279_v29 }
  0x2e   :  { %1459 = vmatprep.mubr.msk.f32.mxu1 %vm14_vm0, %v278_v27 }
  0x30   :  { %1486 = vmatmul.mubr.msk.f32.gmra.mxu0 %vm14_vm0, %v280_v31 }
  0x31   :  { %1460 = vmatmul.mubr.msk.f32.gmra.mxu1 %vm14_vm0, %v279_v29  ;;  %1488 = vmatprep.mubr.msk.f32.mxu0 %vm14_vm0, %v570_v34 }
  0x32   :  { %1462 = vmatprep.mubr.msk.f32.mxu1 %vm14_vm0, %v280_v31 }
  0x34   :  { %1489 = vmatmul.mubr.msk.f32.gmra.mxu0 %vm14_vm0, %v861_v35 }
  0x35   :  { %1463 = vmatmul.mubr.msk.f32.gmra.mxu1 %vm14_vm0, %v570_v34 }
  0xc4   :  { %v1702_v37 = vpop.f32.mrf.mxu1 }
  0xc5   :  { %v1417_v36 = vpop.f32.mrf.mxu0  ;;  %v548_v31 = vadd.f32 %v1702_v37, %v1719_v50 }
  0xc6   :  { %v1704_v39 = vpop.f32.mrf.mxu1  ;;  %v540_v53 = vadd.f32 %v1417_v36, %v1719_v50 }
  0xc7   :  { %v460_v38 = vpop.f32.mrf.mxu0  ;;  %v547_v35 = vadd.f32 %v1719_v50, %v1704_v39 }
  0xc8   :  { %v539_v56 = vadd.f32 %v1719_v50, %v460_v38 }
  0xcc   :  { %v1420_v40 = vpop.f32.mrf.mxu0 }
  0xcd   :  { %v1706_v41 = vpop.f32.mrf.mxu1  ;;  %v542_v60 = vadd.f32 %v1420_v40, %v1719_v50 }
  0xce   :  { %v470_v42 = vpop.f32.mrf.mxu0  ;;  %v550_v37 = vadd.f32 %v1706_v41, %v1719_v50 }
  0xcf   :  { %v1708_v43 = vpop.f32.mrf.mxu1  ;;  %v541_v1 = vadd.f32 %v1719_v50, %v470_v42 }
  0xd0   :  { %v1423_v44 = vpop.f32.mrf.mxu0 }
  0xd1   :  { %v1710_v45 = vpop.f32.mrf.mxu1  ;;  %v544_v5 = vadd.f32 %v1423_v44, %v1719_v50 }
  0xd2   :  { %v480_v46 = vpop.f32.mrf.mxu0 }
  0xd3   :  { %v1712_v47 = vpop.f32.mrf.mxu1  ;;  %v543_v11 = vadd.f32 %v1719_v50, %v480_v46 }
  0xd4   :  { %v1426_v48 = vpop.f32.mrf.mxu0 }
  0xd5   :  { %v1714_v49 = vpop.f32.mrf.mxu1  ;;  %v546_v17 = vadd.f32 %v1426_v48, %v1719_v50 }
  0xd6   :  { %v490_v51 = vpop.f32.mrf.mxu0 }
  0xd7   :  { %v1721_v52 = vpop.f32.mrf.mxu1  ;;  %v545_v23 = vadd.f32 %v1719_v50, %v490_v51 }
  0xd8   :  { %v1469_v55 = vpop.f32.mrf.mxu0 }
  0xd9   :  { %v1443_v54 = vpop.f32.mrf.mxu1 }
  0xda   :  { %v831_v57 = vadd.f32 %v1443_v54, %v540_v53  ;;  %v1042_v59 = vpop.f32.mrf.mxu0 }
  0xdb   :  { %v751_v58 = vpop.f32.mrf.mxu1 }
  0xdc   :  { %v1726_v61 = vadd.f32 %v1469_v55, %v831_v57  ;;  %v830_v62 = vadd.f32 %v751_v58, %v539_v56  ;;  %v1472_v0 = vpop.f32.mrf.mxu0  ;;  %v549_v55 = vadd.f32 %v1719_v50, %v1708_v43 }
  0xdd   :  { %v1446_v63 = vpop.f32.mrf.mxu1 }
  0xde   :  { %v1138_v2 = vmul.f32 0.5, %v1726_v61  ;;  %v1730_v3 = vadd.f32 %v1042_v59, %v830_v62  ;;  %v833_v4 = vadd.f32 %v1446_v63, %v542_v60  ;;  %v1052_v7 = vpop.f32.mrf.mxu0 }
  0xdf   :  { %v761_v6 = vpop.f32.mrf.mxu1 }
  0xe0   :  { %1495 = vtanh.f32 %v1138_v2  ;;  %v1137_v8 = vmul.f32 0.5, %v1730_v3  ;;  %v1734_v9 = vadd.f32 %v1472_v0, %v833_v4  ;;  %v832_v10 = vadd.f32 %v761_v6, %v541_v1  ;;  %v1475_v13 = vpop.f32.mrf.mxu0 }
  0xe1   :  { %v1449_v12 = vpop.f32.mrf.mxu1  ;;  %v552_v1 = vadd.f32 %v1710_v45, %v1719_v50  ;;  %v551_v6 = vadd.f32 %v1719_v50, %v1712_v47 }
  0xe2   :  { %1497 = vtanh.f32 %v1137_v8  ;;  %v1140_v14 = vmul.f32 0.5, %v1734_v9  ;;  %v1738_v15 = vadd.f32 %v1052_v7, %v832_v10  ;;  %v835_v16 = vadd.f32 %v1449_v12, %v544_v5  ;;  %v1062_v19 = vpop.f32.mrf.mxu0 }
  0xe3   :  { %v771_v18 = vpop.f32.mrf.mxu1 }
  0xe4   :  { %1499 = vtanh.f32 %v1140_v14  ;;  %v1139_v20 = vmul.f32 0.5, %v1738_v15  ;;  %v834_v21 = vadd.f32 %v771_v18, %v543_v11  ;;  %v1742_v22 = vadd.f32 %v1475_v13, %v835_v16  ;;  %v1478_v25 = vpop.f32.mrf.mxu0 }
  0xe5   :  { %v1452_v24 = vpop.f32.mrf.mxu1  ;;  %v554_v16 = vadd.f32 %v1714_v49, %v1719_v50 }
  0xe6   :  { %1501 = vtanh.f32 %v1139_v20  ;;  %v1142_v26 = vmul.f32 0.5, %v1742_v22  ;;  %v837_v27 = vadd.f32 %v1452_v24, %v546_v17  ;;  %v1746_v28 = vadd.f32 %v1062_v19, %v834_v21  ;;  %v1072_v30 = vpop.f32.mrf.mxu0 }
  0xe7   :  { %v781_v29 = vpop.f32.mrf.mxu1  ;;  %v553_v19 = vadd.f32 %v1719_v50, %v1721_v52 }
  0xe8   :  { %v1141_v32 = vmul.f32 0.5, %v1746_v28  ;;  %v836_v33 = vadd.f32 %v781_v29, %v545_v23  ;;  %v1751_v34 = vadd.f32 %v1478_v25, %v837_v27  ;;  %1503 = vtanh.f32 %v1142_v26  ;;  %v1481_v38 = vpop.f32.mrf.mxu0 }
  0xe9   :  { %v1455_v36 = vpop.f32.mrf.mxu1 }
  0xea   :  { %1505 = vtanh.f32 %v1141_v32  ;;  %v1144_v40 = vmul.f32 0.5, %v1751_v34  ;;  %v839_v42 = vadd.f32 %v1455_v36, %v548_v31  ;;  %v1756_v44 = vadd.f32 %v1072_v30, %v836_v33  ;;  %v1082_v48 = vpop.f32.mrf.mxu0 }
  0xeb   :  { %v791_v46 = vpop.f32.mrf.mxu1 }
  0xec   :  { %v1143_v51 = vmul.f32 0.5, %v1756_v44  ;;  %v838_v53 = vadd.f32 %v791_v46, %v547_v35  ;;  %v1761_v54 = vadd.f32 %v1481_v38, %v839_v42  ;;  %1507 = vtanh.f32 %v1144_v40  ;;  %v1484_v57 = vpop.f32.mrf.mxu0 }
  0xed   :  { %v1496_v39 = vpop.eup %1495  ;;  %v1458_v56 = vpop.f32.mrf.mxu1 }
  0xee   :  { %1509 = vtanh.f32 %v1143_v51  ;;  %v1146_v58 = vmul.f32 0.5, %v1761_v54  ;;  %v841_v59 = vadd.f32 %v1458_v56, %v550_v37  ;;  %v1766_v60 = vadd.f32 %v1082_v48, %v838_v53  ;;  %v1092_v63 = vpop.f32.mrf.mxu0 }
  0xef   :  { %v1498_v62 = vpop.eup %1497  ;;  %v801_v41 = vpop.f32.mrf.mxu1  ;;  %v1170_v0 = vmul.f32 0.5, %v1496_v39 }
  0xf0   :  { %v1145_v2 = vmul.f32 0.5, %v1766_v60  ;;  %v840_v4 = vadd.f32 %v801_v41, %v549_v55  ;;  %v1771_v43 = vadd.f32 %v1484_v57, %v841_v59  ;;  %1511 = vtanh.f32 %v1146_v58  ;;  %v1487_v10 = vpop.f32.mrf.mxu0 }
  0xf1   :  { %v1500_v5 = vpop.eup %1499  ;;  %v1461_v7 = vpop.f32.mrf.mxu1  ;;  %v1186_v8 = vadd.f32 0.5, %v1170_v0  ;;  %v1169_v11 = vmul.f32 0.5, %v1498_v62 }
  0xf2   :  { %1513 = vtanh.f32 %v1145_v2  ;;  %v1148_v12 = vmul.f32 0.5, %v1771_v43  ;;  %v843_v13 = vadd.f32 %v1461_v7, %v552_v1  ;;  %v1776_v14 = vadd.f32 %v1092_v63, %v840_v4  ;;  %v1102_v47 = vpop.f32.mrf.mxu0 }
  0xf3   :  { %v1502_v45 = vpop.eup %1501  ;;  %1235 = vrot.lane.b32.xlu0 %v1186_v8, %s1560_s2  ;;  %v811_v17 = vpop.f32.mrf.mxu1  ;;  %v1172_v18 = vmul.f32 0.5, %v1500_v5  ;;  %v1185_v25 = vadd.f32 0.5, %v1169_v11 }
  0xf4   :  { %v1147_v20 = vmul.f32 0.5, %v1776_v14  ;;  %v842_v21 = vadd.f32 %v811_v17, %v551_v6  ;;  %v1784_v23 = vadd.f32 %v1487_v10, %v843_v13  ;;  %1515 = vtanh.f32 %v1148_v12  ;;  %v1490_v27 = vpop.f32.mrf.mxu0 }
  0xf5   :  { %v1464_v24 = vpop.f32.mrf.mxu1  ;;  %v1188_v26 = vadd.f32 0.5, %v1172_v18  ;;  %v1171_v49 = vmul.f32 0.5, %v1502_v45  ;;  %v1504_v29 = vpop.eup %1503 }
  0xf6   :  { %1517 = vtanh.f32 %v1147_v20  ;;  %v1150_v30 = vmul.f32 0.5, %v1784_v23  ;;  %v845_v31 = vadd.f32 %v1464_v24, %v554_v16  ;;  %v1787_v32 = vadd.f32 %v1102_v47, %v842_v21  ;;  %v1112_v52 = vpop.f32.mrf.mxu0 }
  0xf7   :  { %v1506_v33 = vpop.eup %1505  ;;  %1233 = vrot.lane.b32.xlu0 %v1185_v25, %s1560_s2  ;;  %1239 = vrot.lane.b32.xlu1 %v1188_v26, %s1560_s2  ;;  %v821_v50 = vpop.f32.mrf.mxu1  ;;  %v1187_v40 = vadd.f32 0.5, %v1171_v49  ;;  %v1174_v46 = vmul.f32 0.5, %v1504_v29 }
  0xf8   :  { %v1149_v35 = vmul.f32 0.5, %v1787_v32  ;;  %v844_v36 = vadd.f32 %v821_v50, %v553_v19  ;;  %v1792_v38 = vadd.f32 %v1490_v27, %v845_v31  ;;  %1519 = vtanh.f32 %v1150_v30 }
  0xf9   :  { %v1173_v42 = vmul.f32 0.5, %v1506_v33  ;;  %v1508_v48 = vpop.eup %1507  ;;  %v1190_v57 = vadd.f32 0.5, %v1174_v46 }
  0xfa   :  { %1521 = vtanh.f32 %v1149_v35  ;;  %v1152_v37 = vmul.f32 0.5, %v1792_v38  ;;  %v1795_v51 = vadd.f32 %v1112_v52, %v844_v36  ;;  %v1176_v58 = vmul.f32 0.5, %v1508_v48 }
  0xfb   :  { %v1510_v53 = vpop.eup %1509  ;;  %1237 = vrot.lane.b32.xlu1 %v1187_v40, %s1560_s2  ;;  %v1189_v39 = vadd.f32 0.5, %v1173_v42 }
  0xfc   :  { %v1151_v55 = vmul.f32 0.5, %v1795_v51  ;;  %v1175_v56 = vmul.f32 0.5, %v1510_v53  ;;  %1523 = vtanh.f32 %v1152_v37  ;;  %v1192_v0 = vadd.f32 0.5, %v1176_v58 }
  0xfd   :  { %1241 = vrot.lane.b32.xlu0 %v1189_v39, %s1560_s2  ;;  %v1512_v59 = vpop.eup %1511 }
  0xfe   :  { %1525 = vtanh.f32 %v1151_v55  ;;  %v1191_v62 = vadd.f32 0.5, %v1175_v56  ;;  %v1178_v1 = vmul.f32 0.5, %v1512_v59 }
  0xff   :  { %v1514_v41 = vpop.eup %1513  ;;  %1243 = vrot.lane.b32.xlu1 %v1190_v57, %s1560_s2  ;;  %1527 = vtanh.f32 %v1726_v61 }
 0x100   :  { %v1177_v63 = vmul.f32 0.5, %v1514_v41  ;;  %v1194_v7 = vadd.f32 0.5, %v1178_v1  ;;  %1529 = vtanh.f32 %v1730_v3 }
 0x101   :  { %1245 = vrot.lane.b32.xlu0 %v1191_v62, %s1560_s2  ;;  %v1516_v2 = vpop.eup %1515  ;;  %1531 = vtanh.f32 %v1734_v9 }
 0x102   :  { %v1193_v4 = vadd.f32 0.5, %v1177_v63  ;;  %v1180_v8 = vmul.f32 0.5, %v1516_v2  ;;  %1533 = vtanh.f32 %v1738_v15 }
 0x103   :  { %v1518_v5 = vpop.eup %1517  ;;  %1247 = vrot.lane.b32.xlu1 %v1192_v0, %s1560_s2  ;;  %1535 = vtanh.f32 %v1746_v28 }
 0x104   :  { %v1179_v6 = vmul.f32 0.5, %v1518_v5  ;;  %v1196_v45 = vadd.f32 0.5, %v1180_v8  ;;  %1537 = vtanh.f32 %v1742_v22 }
 0x105   :  { %1249 = vrot.lane.b32.xlu0 %v1193_v4, %s1560_s2  ;;  %v1520_v10 = vpop.eup %1519  ;;  %1539 = vtanh.f32 %v1756_v44 }
 0x106   :  { %v1195_v11 = vadd.f32 0.5, %v1179_v6  ;;  %v1182_v16 = vmul.f32 0.5, %v1520_v10  ;;  %1541 = vtanh.f32 %v1751_v34 }
 0x107   :  { %v1522_v12 = vpop.eup %1521  ;;  %1251 = vrot.lane.b32.xlu1 %v1194_v7, %s1560_s2  ;;  %1543 = vtanh.f32 %v1766_v60 }
 0x108   :  { %v1181_v13 = vmul.f32 0.5, %v1522_v12  ;;  %v1198_v20 = vadd.f32 0.5, %v1182_v16  ;;  %1545 = vtanh.f32 %v1761_v54 }
 0x109   :  { %1253 = vrot.lane.b32.xlu0 %v1195_v11, %s1560_s2  ;;  %v1524_v17 = vpop.eup %1523  ;;  %1547 = vtanh.f32 %v1776_v14 }
 0x10a   :  { %v1197_v47 = vadd.f32 0.5, %v1181_v13  ;;  %v1184_v21 = vmul.f32 0.5, %v1524_v17  ;;  %1549 = vtanh.f32 %v1771_v43 }
 0x10b   :  { %v1526_v18 = vpop.eup %1525  ;;  %1255 = vrot.lane.b32.xlu1 %v1196_v45, %s1560_s2  ;;  %1551 = vtanh.f32 %v1787_v32 }
 0x10c   :  { %v1183_v19 = vmul.f32 0.5, %v1526_v18  ;;  %v1200_v25 = vadd.f32 0.5, %v1184_v21  ;;  %v1528_v26 = vpop.eup %1527  ;;  %1553 = vtanh.f32 %v1784_v23 }
 0x10d   :  { %1257 = vrot.lane.b32.xlu0 %v1197_v47, %s1560_s2  ;;  %v1530_v29 = vpop.eup %1529  ;;  %1555 = vtanh.f32 %v1795_v51 }
 0x10e   :  { %v1199_v24 = vadd.f32 0.5, %v1183_v19  ;;  %v1532_v61 = vpop.eup %1531  ;;  %1557 = vtanh.f32 %v1792_v38 }
 0x10f   :  { %1259 = vrot.lane.b32.xlu1 %v1198_v20, %s1560_s2  ;;  %v1534_v28 = vpop.eup %1533 }
 0x110   :  { %v1536_v60 = vpop.eup %1535 }
 0x111   :  { %1261 = vrot.lane.b32.xlu0 %v1199_v24, %s1560_s2  ;;  %v1538_v31 = vpop.eup %1537 }
 0x112   :  { %v1540_v50 = vpop.eup %1539 }
 0x113   :  { %1263 = vrot.lane.b32.xlu1 %v1200_v25, %s1560_s2  ;;  %v1542_v35 = vpop.eup %1541 }
 0x114   :  { %v1544_v40 = vpop.eup %1543 }
 0x115   :  { %v1546_v46 = vpop.eup %1545 }
 0x116   :  { %v1548_v51 = vpop.eup %1547 }
 0x117   :  { %v1550_v39 = vpop.eup %1549 }
 0x118   :  { %v1552_v57 = vpop.eup %1551 }
 0x119   :  { %v1554_v62 = vpop.eup %1553 }
 0x11a   :  { %v1556_v0 = vpop.eup %1555 }
 0x11b   :  { %v1558_v4 = vpop.eup %1557 }
 0x165   :  { %v1236_v27 = vpop.permute.xlu0 %1235 }
 0x166   :  { %v1282_v49 = vmul.f32 %v1528_v26, %v1236_v27 }
 0x168   :  { %1298 = vst.msk [vmem:[%s1894_s3 + $0x8] sm:$0xff] %vm14_vm0, %v1282_v49 }
 0x169   :  { %v1234_v3 = vpop.permute.xlu0 %1233  ;;  %v1240_v9 = vpop.permute.xlu1 %1239 }
 0x16a   :  { %v1281_v15 = vmul.f32 %v1530_v29, %v1234_v3  ;;  %v1284_v22 = vmul.f32 %v1532_v61, %v1240_v9 }
 0x16c   :  { %1297 = vst.msk [vmem:[%s1894_s3] sm:$0xff] %vm14_vm0, %v1281_v15  ;;  %1300 = vst.msk [vmem:[%s1894_s3 + $0x18] sm:$0xff] %vm14_vm0, %v1284_v22 }
 0x16d   :  { %v1238_v34 = vpop.permute.xlu1 %1237 }
 0x16e   :  { %v1283_v44 = vmul.f32 %v1534_v28, %v1238_v34 }
 0x16f   :  { %v1242_v30 = vpop.permute.xlu0 %1241 }
 0x170   :  { %1299 = vst.msk [vmem:[%s1894_s3 + $0x10] sm:$0xff] %vm14_vm0, %v1283_v44  ;;  %v1285_v54 = vmul.f32 %v1536_v60, %v1242_v30 }
 0x171   :  { %v1244_v33 = vpop.permute.xlu1 %1243 }
 0x172   :  { %1301 = vst.msk [vmem:[%s1894_s3 + $0x20] sm:$0xff] %vm14_vm0, %v1285_v54  ;;  %v1286_v14 = vmul.f32 %v1538_v31, %v1244_v33 }
 0x173   :  { %v1246_v52 = vpop.permute.xlu0 %1245 }
 0x174   :  { %1302 = vst.msk [vmem:[%s1894_s3 + $0x28] sm:$0xff] %vm14_vm0, %v1286_v14  ;;  %v1287_v43 = vmul.f32 %v1540_v50, %v1246_v52 }
 0x175   :  { %v1248_v36 = vpop.permute.xlu1 %1247 }
 0x176   :  { %1303 = vst.msk [vmem:[%s1894_s3 + $0x30] sm:$0xff] %vm14_vm0, %v1287_v43  ;;  %v1288_v32 = vmul.f32 %v1542_v35, %v1248_v36 }
 0x177   :  { %v1250_v42 = vpop.permute.xlu0 %1249 }
 0x178   :  { %1304 = vst.msk [vmem:[%s1894_s3 + $0x38] sm:$0xff] %vm14_vm0, %v1288_v32  ;;  %v1289_v23 = vmul.f32 %v1544_v40, %v1250_v42 }
 0x179   :  { %v1252_v48 = vpop.permute.xlu1 %1251 }
 0x17a   :  { %1305 = vst.msk [vmem:[%s1894_s3 + $0x40] sm:$0xff] %vm14_vm0, %v1289_v23  ;;  %v1290_v37 = vmul.f32 %v1546_v46, %v1252_v48 }
 0x17b   :  { %v1254_v53 = vpop.permute.xlu0 %1253 }
 0x17c   :  { %1306 = vst.msk [vmem:[%s1894_s3 + $0x48] sm:$0xff] %vm14_vm0, %v1290_v37  ;;  %v1291_v38 = vmul.f32 %v1548_v51, %v1254_v53 }
 0x17d   :  { %v1256_v55 = vpop.permute.xlu1 %1255 }
 0x17e   :  { %1307 = vst.msk [vmem:[%s1894_s3 + $0x50] sm:$0xff] %vm14_vm0, %v1291_v38  ;;  %v1292_v56 = vmul.f32 %v1550_v39, %v1256_v55 }
 0x17f   :  { %v1258_v58 = vpop.permute.xlu0 %1257 }
 0x180   :  { %1308 = vst.msk [vmem:[%s1894_s3 + $0x58] sm:$0xff] %vm14_vm0, %v1292_v56  ;;  %v1293_v59 = vmul.f32 %v1552_v57, %v1258_v58 }
 0x181   :  { %v1260_v41 = vpop.permute.xlu1 %1259 }
 0x182   :  { %1309 = vst.msk [vmem:[%s1894_s3 + $0x60] sm:$0xff] %vm14_vm0, %v1293_v59  ;;  %v1294_v63 = vmul.f32 %v1554_v62, %v1260_v41 }
 0x183   :  { %v1262_v1 = vpop.permute.xlu0 %1261 }
 0x184   :  { %1310 = vst.msk [vmem:[%s1894_s3 + $0x68] sm:$0xff] %vm14_vm0, %v1294_v63  ;;  %v1295_v2 = vmul.f32 %v1556_v0, %v1262_v1 }
 0x185   :  { %v1264_v5 = vpop.permute.xlu1 %1263 }
 0x186   :  { %1311 = vst.msk [vmem:[%s1894_s3 + $0x70] sm:$0xff] %vm14_vm0, %v1295_v2  ;;  %v1296_v6 = vmul.f32 %v1558_v4, %v1264_v5 }
 0x188   :  { %1312 = vst.msk [vmem:[%s1894_s3 + $0x78] sm:$0xff] %vm14_vm0, %v1296_v6 }

</bundles_post_ra>
